<compile_context>
chip_gen: v5e
topology: v5e:2x2
jax: 0.10.0
libtpu: 0.0.40
codegen_flags: <defaults>
</compile_context>

<pallas_src>
import functools

import jax
import jax.numpy as jnp
from jax.experimental import pallas as pl
from jax.experimental.pallas import tpu as pltpu


def net_kernel(p_ref, x_ref, o_ref, *, h_dim):
    # p_ref: (3*h_dim + 1,) f32 in SMEM — [w1 (H) | b1 (H) | w2 (H) | b2 (1)].
    # x_ref: (1, NP) f32 in VMEM — batch along lanes, zero-padded to 128 multiple.
    # o_ref: (1, NP) f32 in VMEM.
    x_row = x_ref[...]                                   # one unmasked vld
    acc = jnp.zeros_like(x_row)
    # Unrolled over H (static): pure VALU with scalar SMEM operands; no XLU/MXU/EUP.
    for h in range(h_dim):
        w1_h = p_ref[h]
        b1_h = p_ref[h_dim + h]
        w2_h = p_ref[2 * h_dim + h]
        acc = acc + jnp.maximum(w1_h * x_row + b1_h, 0.0) * w2_h
    acc = acc + p_ref[3 * h_dim]                         # + b2
    o_ref[...] = acc.astype(o_ref.dtype)                 # one unmasked vst


def pack_params(w1, b1, w2, b2):
    """Pack Linear params into one flat f32 array: [w1 | b1 | w2 | b2]. Done once."""
    return jnp.concatenate(
        [
            w1.reshape(-1),
            b1.reshape(-1),
            w2.reshape(-1),
            b2.reshape(-1),
        ]
    ).astype(jnp.float32)


def _net_forward(x, packed):
    """x: (N, 1) f32; packed: (3H+1,) f32. Returns (N, 1) f32."""
    n, f = x.shape
    assert f == 1, "kernel is specialized to n_feature=1"
    h_dim = (packed.shape[0] - 1) // 3

    n_pad = ((n + 127) // 128) * 128                     # lane-dense, unmasked vld/vst
    x_row = jnp.zeros((1, n_pad), jnp.float32).at[:, :n].set(
        x.reshape(1, n).astype(jnp.float32)
    )

    smem = pl.BlockSpec(memory_space=pltpu.MemorySpace.SMEM)
    vmem = pl.BlockSpec(memory_space=pltpu.MemorySpace.VMEM)
    y_row = pl.pallas_call(
        functools.partial(net_kernel, h_dim=h_dim),
        out_shape=jax.ShapeDtypeStruct((1, n_pad), jnp.float32),
        in_specs=[smem, vmem],
        out_specs=vmem,
    )(packed, x_row)

    # Padded lanes hold relu(b1)*w2 + b2 garbage — slice them off before reshaping.
    return y_row[:, :n].reshape(n, 1)


net_forward = jax.jit(_net_forward)


def init_params(key, n_feature, n_hidden, n_output):
    # Deterministic init mimicking torch.nn.Linear default: U(-1/sqrt(fan_in), 1/sqrt(fan_in)).
    k1, k2, k3, k4 = jax.random.split(key, 4)
    lim1 = 1.0 / jnp.sqrt(jnp.float32(n_feature))
    lim2 = 1.0 / jnp.sqrt(jnp.float32(n_hidden))
    w1 = jax.random.uniform(k1, (n_feature, n_hidden), jnp.float32, -lim1, lim1)
    b1 = jax.random.uniform(k2, (1, n_hidden), jnp.float32, -lim1, lim1)
    w2 = jax.random.uniform(k3, (n_hidden, n_output), jnp.float32, -lim2, lim2)
    b2 = jax.random.uniform(k4, (1, n_output), jnp.float32, -lim2, lim2)
    return w1, b1, w2, b2


if __name__ == "__main__":
    n_feature, n_hidden, n_output = 1, 10, 1
    N = 50

    key = jax.random.PRNGKey(0)
    kx, kp = jax.random.split(key)

    # Same input as the original script: linspace(-1, 1, 50) unsqueezed to (50, 1).
    x = jnp.linspace(-1.0, 1.0, N, dtype=jnp.float32).reshape(N, 1)

    w1, b1, w2, b2 = init_params(kp, n_feature, n_hidden, n_output)
    packed = pack_params(w1, b1, w2, b2)                 # hoisted: packed once, reused

    out = net_forward(x, packed)
    out = jax.block_until_ready(out)

    # Reference check in plain JAX (torch.nn.Linear semantics with pre-transposed weights).
    ref = jnp.maximum(x @ w1 + b1, 0.0) @ w2 + b2
    assert out.shape == (N, n_output)
    assert jnp.allclose(out, ref, atol=1e-5), "mismatch vs reference"

    print("KERNEL_OK")
</pallas_src>

<mosaic_0001>
module attributes {stable_mosaic.version = 11 : i64} {
  func.func @net_kernel(%arg0: memref<31xf32, #tpu.memory_space<smem>>, %arg1: memref<1x128xf32, #tpu.memory_space<vmem>>, %arg2: memref<1x128xf32, #tpu.memory_space<vmem>>) attributes {dimension_semantics = [], scalar_prefetch = 0 : i64, scratch_operands = 0 : i64, tpu.core_type = #tpu.core_type<tc>} {
    %c0 = arith.constant 0 : index
    %c0_0 = arith.constant 0 : index
    %0 = vector.load %arg1[%c0, %c0_0] : memref<1x128xf32, #tpu.memory_space<vmem>>, vector<1x128xf32>
    %cst = arith.constant 0.000000e+00 : f32
    %1 = vector.broadcast %cst : f32 to vector<1x128xf32>
    %c0_1 = arith.constant 0 : index
    %2 = memref.load %arg0[%c0_1] : memref<31xf32, #tpu.memory_space<smem>>
    %c10 = arith.constant 10 : index
    %3 = memref.load %arg0[%c10] : memref<31xf32, #tpu.memory_space<smem>>
    %c20 = arith.constant 20 : index
    %4 = memref.load %arg0[%c20] : memref<31xf32, #tpu.memory_space<smem>>
    %5 = vector.broadcast %2 : f32 to vector<1x128xf32>
    %6 = arith.mulf %5, %0 : vector<1x128xf32>
    %7 = vector.broadcast %3 : f32 to vector<1x128xf32>
    %8 = arith.addf %6, %7 : vector<1x128xf32>
    %cst_2 = arith.constant 0.000000e+00 : f32
    %9 = vector.broadcast %cst_2 : f32 to vector<1x128xf32>
    %10 = arith.maximumf %8, %9 : vector<1x128xf32>
    %11 = vector.broadcast %4 : f32 to vector<1x128xf32>
    %12 = arith.mulf %10, %11 : vector<1x128xf32>
    %13 = arith.addf %1, %12 : vector<1x128xf32>
    %c1 = arith.constant 1 : index
    %14 = memref.load %arg0[%c1] : memref<31xf32, #tpu.memory_space<smem>>
    %c11 = arith.constant 11 : index
    %15 = memref.load %arg0[%c11] : memref<31xf32, #tpu.memory_space<smem>>
    %c21 = arith.constant 21 : index
    %16 = memref.load %arg0[%c21] : memref<31xf32, #tpu.memory_space<smem>>
    %17 = vector.broadcast %14 : f32 to vector<1x128xf32>
    %18 = arith.mulf %17, %0 : vector<1x128xf32>
    %19 = vector.broadcast %15 : f32 to vector<1x128xf32>
    %20 = arith.addf %18, %19 : vector<1x128xf32>
    %cst_3 = arith.constant 0.000000e+00 : f32
    %21 = vector.broadcast %cst_3 : f32 to vector<1x128xf32>
    %22 = arith.maximumf %20, %21 : vector<1x128xf32>
    %23 = vector.broadcast %16 : f32 to vector<1x128xf32>
    %24 = arith.mulf %22, %23 : vector<1x128xf32>
    %25 = arith.addf %13, %24 : vector<1x128xf32>
    %c2 = arith.constant 2 : index
    %26 = memref.load %arg0[%c2] : memref<31xf32, #tpu.memory_space<smem>>
    %c12 = arith.constant 12 : index
    %27 = memref.load %arg0[%c12] : memref<31xf32, #tpu.memory_space<smem>>
    %c22 = arith.constant 22 : index
    %28 = memref.load %arg0[%c22] : memref<31xf32, #tpu.memory_space<smem>>
    %29 = vector.broadcast %26 : f32 to vector<1x128xf32>
    %30 = arith.mulf %29, %0 : vector<1x128xf32>
    %31 = vector.broadcast %27 : f32 to vector<1x128xf32>
    %32 = arith.addf %30, %31 : vector<1x128xf32>
    %cst_4 = arith.constant 0.000000e+00 : f32
    %33 = vector.broadcast %cst_4 : f32 to vector<1x128xf32>
    %34 = arith.maximumf %32, %33 : vector<1x128xf32>
    %35 = vector.broadcast %28 : f32 to vector<1x128xf32>
    %36 = arith.mulf %34, %35 : vector<1x128xf32>
    %37 = arith.addf %25, %36 : vector<1x128xf32>
    %c3 = arith.constant 3 : index
    %38 = memref.load %arg0[%c3] : memref<31xf32, #tpu.memory_space<smem>>
    %c13 = arith.constant 13 : index
    %39 = memref.load %arg0[%c13] : memref<31xf32, #tpu.memory_space<smem>>
    %c23 = arith.constant 23 : index
    %40 = memref.load %arg0[%c23] : memref<31xf32, #tpu.memory_space<smem>>
    %41 = vector.broadcast %38 : f32 to vector<1x128xf32>
    %42 = arith.mulf %41, %0 : vector<1x128xf32>
    %43 = vector.broadcast %39 : f32 to vector<1x128xf32>
    %44 = arith.addf %42, %43 : vector<1x128xf32>
    %cst_5 = arith.constant 0.000000e+00 : f32
    %45 = vector.broadcast %cst_5 : f32 to vector<1x128xf32>
    %46 = arith.maximumf %44, %45 : vector<1x128xf32>
    %47 = vector.broadcast %40 : f32 to vector<1x128xf32>
    %48 = arith.mulf %46, %47 : vector<1x128xf32>
    %49 = arith.addf %37, %48 : vector<1x128xf32>
    %c4 = arith.constant 4 : index
    %50 = memref.load %arg0[%c4] : memref<31xf32, #tpu.memory_space<smem>>
    %c14 = arith.constant 14 : index
    %51 = memref.load %arg0[%c14] : memref<31xf32, #tpu.memory_space<smem>>
    %c24 = arith.constant 24 : index
    %52 = memref.load %arg0[%c24] : memref<31xf32, #tpu.memory_space<smem>>
    %53 = vector.broadcast %50 : f32 to vector<1x128xf32>
    %54 = arith.mulf %53, %0 : vector<1x128xf32>
    %55 = vector.broadcast %51 : f32 to vector<1x128xf32>
    %56 = arith.addf %54, %55 : vector<1x128xf32>
    %cst_6 = arith.constant 0.000000e+00 : f32
    %57 = vector.broadcast %cst_6 : f32 to vector<1x128xf32>
    %58 = arith.maximumf %56, %57 : vector<1x128xf32>
    %59 = vector.broadcast %52 : f32 to vector<1x128xf32>
    %60 = arith.mulf %58, %59 : vector<1x128xf32>
    %61 = arith.addf %49, %60 : vector<1x128xf32>
    %c5 = arith.constant 5 : index
    %62 = memref.load %arg0[%c5] : memref<31xf32, #tpu.memory_space<smem>>
    %c15 = arith.constant 15 : index
    %63 = memref.load %arg0[%c15] : memref<31xf32, #tpu.memory_space<smem>>
    %c25 = arith.constant 25 : index
    %64 = memref.load %arg0[%c25] : memref<31xf32, #tpu.memory_space<smem>>
    %65 = vector.broadcast %62 : f32 to vector<1x128xf32>
    %66 = arith.mulf %65, %0 : vector<1x128xf32>
    %67 = vector.broadcast %63 : f32 to vector<1x128xf32>
    %68 = arith.addf %66, %67 : vector<1x128xf32>
    %cst_7 = arith.constant 0.000000e+00 : f32
    %69 = vector.broadcast %cst_7 : f32 to vector<1x128xf32>
    %70 = arith.maximumf %68, %69 : vector<1x128xf32>
    %71 = vector.broadcast %64 : f32 to vector<1x128xf32>
    %72 = arith.mulf %70, %71 : vector<1x128xf32>
    %73 = arith.addf %61, %72 : vector<1x128xf32>
    %c6 = arith.constant 6 : index
    %74 = memref.load %arg0[%c6] : memref<31xf32, #tpu.memory_space<smem>>
    %c16 = arith.constant 16 : index
    %75 = memref.load %arg0[%c16] : memref<31xf32, #tpu.memory_space<smem>>
    %c26 = arith.constant 26 : index
    %76 = memref.load %arg0[%c26] : memref<31xf32, #tpu.memory_space<smem>>
    %77 = vector.broadcast %74 : f32 to vector<1x128xf32>
    %78 = arith.mulf %77, %0 : vector<1x128xf32>
    %79 = vector.broadcast %75 : f32 to vector<1x128xf32>
    %80 = arith.addf %78, %79 : vector<1x128xf32>
    %cst_8 = arith.constant 0.000000e+00 : f32
    %81 = vector.broadcast %cst_8 : f32 to vector<1x128xf32>
    %82 = arith.maximumf %80, %81 : vector<1x128xf32>
    %83 = vector.broadcast %76 : f32 to vector<1x128xf32>
    %84 = arith.mulf %82, %83 : vector<1x128xf32>
    %85 = arith.addf %73, %84 : vector<1x128xf32>
    %c7 = arith.constant 7 : index
    %86 = memref.load %arg0[%c7] : memref<31xf32, #tpu.memory_space<smem>>
    %c17 = arith.constant 17 : index
    %87 = memref.load %arg0[%c17] : memref<31xf32, #tpu.memory_space<smem>>
    %c27 = arith.constant 27 : index
    %88 = memref.load %arg0[%c27] : memref<31xf32, #tpu.memory_space<smem>>
    %89 = vector.broadcast %86 : f32 to vector<1x128xf32>
    %90 = arith.mulf %89, %0 : vector<1x128xf32>
    %91 = vector.broadcast %87 : f32 to vector<1x128xf32>
    %92 = arith.addf %90, %91 : vector<1x128xf32>
    %cst_9 = arith.constant 0.000000e+00 : f32
    %93 = vector.broadcast %cst_9 : f32 to vector<1x128xf32>
    %94 = arith.maximumf %92, %93 : vector<1x128xf32>
    %95 = vector.broadcast %88 : f32 to vector<1x128xf32>
    %96 = arith.mulf %94, %95 : vector<1x128xf32>
    %97 = arith.addf %85, %96 : vector<1x128xf32>
    %c8 = arith.constant 8 : index
    %98 = memref.load %arg0[%c8] : memref<31xf32, #tpu.memory_space<smem>>
    %c18 = arith.constant 18 : index
    %99 = memref.load %arg0[%c18] : memref<31xf32, #tpu.memory_space<smem>>
    %c28 = arith.constant 28 : index
    %100 = memref.load %arg0[%c28] : memref<31xf32, #tpu.memory_space<smem>>
    %101 = vector.broadcast %98 : f32 to vector<1x128xf32>
    %102 = arith.mulf %101, %0 : vector<1x128xf32>
    %103 = vector.broadcast %99 : f32 to vector<1x128xf32>
    %104 = arith.addf %102, %103 : vector<1x128xf32>
    %cst_10 = arith.constant 0.000000e+00 : f32
    %105 = vector.broadcast %cst_10 : f32 to vector<1x128xf32>
    %106 = arith.maximumf %104, %105 : vector<1x128xf32>
    %107 = vector.broadcast %100 : f32 to vector<1x128xf32>
    %108 = arith.mulf %106, %107 : vector<1x128xf32>
    %109 = arith.addf %97, %108 : vector<1x128xf32>
    %c9 = arith.constant 9 : index
    %110 = memref.load %arg0[%c9] : memref<31xf32, #tpu.memory_space<smem>>
    %c19 = arith.constant 19 : index
    %111 = memref.load %arg0[%c19] : memref<31xf32, #tpu.memory_space<smem>>
    %c29 = arith.constant 29 : index
    %112 = memref.load %arg0[%c29] : memref<31xf32, #tpu.memory_space<smem>>
    %113 = vector.broadcast %110 : f32 to vector<1x128xf32>
    %114 = arith.mulf %113, %0 : vector<1x128xf32>
    %115 = vector.broadcast %111 : f32 to vector<1x128xf32>
    %116 = arith.addf %114, %115 : vector<1x128xf32>
    %cst_11 = arith.constant 0.000000e+00 : f32
    %117 = vector.broadcast %cst_11 : f32 to vector<1x128xf32>
    %118 = arith.maximumf %116, %117 : vector<1x128xf32>
    %119 = vector.broadcast %112 : f32 to vector<1x128xf32>
    %120 = arith.mulf %118, %119 : vector<1x128xf32>
    %121 = arith.addf %109, %120 : vector<1x128xf32>
    %c30 = arith.constant 30 : index
    %122 = memref.load %arg0[%c30] : memref<31xf32, #tpu.memory_space<smem>>
    %123 = vector.broadcast %122 : f32 to vector<1x128xf32>
    %124 = arith.addf %121, %123 : vector<1x128xf32>
    %c0_12 = arith.constant 0 : index
    %c0_13 = arith.constant 0 : index
    %125 = vector.load %arg2[%c0_12, %c0_13] : memref<1x128xf32, #tpu.memory_space<vmem>>, vector<1x128xf32>
    tpu.vector_store %arg2[%c0_12, %c0_13], %124 {strides = array<i32>} : memref<1x128xf32, #tpu.memory_space<vmem>>, vector<1x128xf32>,
    return
  }
}

</mosaic_0001>

<bundles_post_ra>
// kernel: _net_forward.1
= control target key start
LH: loop header
LB: loop body
LE: loop exit
PB: predicated region body
PF: predicated region fallthrough
CT: control target
= control target key end

     0   :  { %7 = vsyncpa [#allocation3], 0  ;;  %s189_s12 = smov [#allocation2]   ;;  %s247_s0 = inlined_call_operand.vmem [shape: f32[31], index: 0, kind: input, shape index: {}]   ;;  %s248_s1 = inlined_call_operand.vmem [shape: f32[1,128], index: 1, kind: input, shape index: {}]   ;;  %s249_s2 = inlined_call_operand.vmem [shape: f32[1,128], index: 2, kind: output, shape index: {}]  }
   0x1   :  { %s13_s11 = sshll.u32 %s247_s0, 4  ;;  %s14_s11 = int_to_ptr.vmem [resolvable:$true] %s13_s11 }
   0x2   :  { %16 = dma.vmem_to_smem %s14_s11, 16, %s189_s12, [#allocation3]  }
   0x3   :  { %187 = dma.done.wait [#allocation3], 16  }
   0x4   :  { %188 = vsyncadd [#allocation3], 4294967280 }
   0x5   :  { %23 = sfence }
   0x6   :  { %s25_s13 = sld [smem:[#allocation2]]  ;;  %v211_v0 = vld [vmem:[%s248_s1] sm:$0x1] }
   0x7   :  { %s144_s14 = sld [smem:[#allocation2 + $0xa]] }
   0x8   :  { %s145_s15 = sld [smem:[#allocation2 + $0x14]] }
   0x9   :  { %s146_s16 = sld [smem:[#allocation2 + $0x1]] }
   0xa   :  { %s147_s19 = sld [smem:[#allocation2 + $0xb]] }
   0xb   :  { %s148_s20 = sld [smem:[#allocation2 + $0x15]] }
   0xc   :  { %v28_v1 = vstv %s25_s13  ;;  %s149_s21 = sld [smem:[#allocation2 + $0x2]] }
   0xd   :  { %v29_v2 = vmul.f32 %v28_v1, %v211_v0  ;;  %v30_v3 = vstv %s144_s14  ;;  %s150_s0 = sld [smem:[#allocation2 + $0xc]] }
   0xe   :  { %s214_s22 = sld [smem:[#allocation2 + $0x16]]  ;;  %v33_v9 = vstv %s145_s15 }
   0xf   :  { %v31_v4 = vadd.f32 %v30_v3, %v29_v2  ;;  %v39_v5 = vstv %s146_s16  ;;  %s152_s23 = sld [smem:[#allocation2 + $0x3]] }
  0x10   :  { %v40_v6 = vmul.f32 %v39_v5, %v211_v0  ;;  %v41_v7 = vstv %s147_s19  ;;  %s153_s24 = sld [smem:[#allocation2 + $0xd]] }
  0x11   :  { %v32_v8 = vmax.f32 %v31_v4, 0.0  ;;  %s217_s1 = sld [smem:[#allocation2 + $0x17]]  ;;  %v44_v12 = vstv %s148_s20 }
  0x12   :  { %v42_v10 = vadd.f32 %v41_v7, %v40_v6  ;;  %v50_v11 = vstv %s149_s21  ;;  %s155_s25 = sld [smem:[#allocation2 + $0x4]] }
  0x13   :  { %v51_v13 = vmul.f32 %v50_v11, %v211_v0  ;;  %v52_v14 = vstv %s150_s0  ;;  %s156_s26 = sld [smem:[#allocation2 + $0xe]]  ;;  %v34_v15 = vmul.f32 %v33_v9, %v32_v8 }
  0x14   :  { %v43_v16 = vmax.f32 %v42_v10, 0.0  ;;  %s220_s27 = sld [smem:[#allocation2 + $0x18]]  ;;  %v55_v20 = vstv %s214_s22 }
  0x15   :  { %v53_v17 = vadd.f32 %v52_v14, %v51_v13  ;;  %v61_v18 = vstv %s152_s23  ;;  %s158_s28 = sld [smem:[#allocation2 + $0x5]] }
  0x16   :  { %v45_v19 = vmul.f32 %v44_v12, %v43_v16  ;;  %v62_v21 = vmul.f32 %v61_v18, %v211_v0  ;;  %v63_v22 = vstv %s153_s24  ;;  %s159_s29 = sld [smem:[#allocation2 + $0xf]] }
  0x17   :  { %v54_v23 = vmax.f32 %v53_v17, 0.0  ;;  %s224_s30 = sld [smem:[#allocation2 + $0x19]]  ;;  %v66_v28 = vstv %s217_s1 }
  0x18   :  { %v46_v24 = vadd.f32 %v45_v19, %v34_v15  ;;  %v64_v25 = vadd.f32 %v63_v22, %v62_v21  ;;  %v72_v26 = vstv %s155_s25  ;;  %s161_s3 = sld [smem:[#allocation2 + $0x6]] }
  0x19   :  { %v56_v27 = vmul.f32 %v55_v20, %v54_v23  ;;  %v73_v29 = vmul.f32 %v72_v26, %v211_v0  ;;  %v74_v30 = vstv %s156_s26  ;;  %s162_s4 = sld [smem:[#allocation2 + $0x10]] }
  0x1a   :  { %v65_v31 = vmax.f32 %v64_v25, 0.0  ;;  %s228_s5 = sld [smem:[#allocation2 + $0x1a]]  ;;  %v77_v36 = vstv %s220_s27 }
  0x1b   :  { %v57_v32 = vadd.f32 %v56_v27, %v46_v24  ;;  %v75_v33 = vadd.f32 %v74_v30, %v73_v29  ;;  %v83_v34 = vstv %s158_s28  ;;  %s164_s6 = sld [smem:[#allocation2 + $0x7]] }
  0x1c   :  { %v67_v35 = vmul.f32 %v66_v28, %v65_v31  ;;  %v84_v37 = vmul.f32 %v83_v34, %v211_v0  ;;  %v85_v38 = vstv %s159_s29  ;;  %s165_s7 = sld [smem:[#allocation2 + $0x11]] }
  0x1d   :  { %v76_v39 = vmax.f32 %v75_v33, 0.0  ;;  %s232_s8 = sld [smem:[#allocation2 + $0x1b]]  ;;  %v88_v44 = vstv %s224_s30 }
  0x1e   :  { %v68_v40 = vadd.f32 %v67_v35, %v57_v32  ;;  %v86_v41 = vadd.f32 %v85_v38, %v84_v37  ;;  %v94_v42 = vstv %s161_s3  ;;  %s167_s9 = sld [smem:[#allocation2 + $0x8]] }
  0x1f   :  { %v78_v43 = vmul.f32 %v77_v36, %v76_v39  ;;  %v95_v45 = vmul.f32 %v94_v42, %v211_v0  ;;  %v96_v46 = vstv %s162_s4  ;;  %s168_s10 = sld [smem:[#allocation2 + $0x12]] }
  0x20   :  { %v87_v47 = vmax.f32 %v86_v41, 0.0  ;;  %s236_s11 = sld [smem:[#allocation2 + $0x1c]]  ;;  %v99_v52 = vstv %s228_s5 }
  0x21   :  { %v79_v48 = vadd.f32 %v78_v43, %v68_v40  ;;  %v97_v49 = vadd.f32 %v96_v46, %v95_v45  ;;  %v105_v50 = vstv %s164_s6  ;;  %s170_s12 = sld [smem:[#allocation2 + $0x9]] }
  0x22   :  { %v89_v51 = vmul.f32 %v88_v44, %v87_v47  ;;  %v106_v53 = vmul.f32 %v105_v50, %v211_v0  ;;  %v107_v54 = vstv %s165_s7  ;;  %s171_s13 = sld [smem:[#allocation2 + $0x13]] }
  0x23   :  { %v98_v55 = vmax.f32 %v97_v49, 0.0  ;;  %s172_s14 = sld [smem:[#allocation2 + $0x1d]]  ;;  %v110_v60 = vstv %s232_s8 }
  0x24   :  { %v90_v56 = vadd.f32 %v89_v51, %v79_v48  ;;  %v108_v57 = vadd.f32 %v107_v54, %v106_v53  ;;  %v116_v58 = vstv %s167_s9  ;;  %s173_s15 = sld [smem:[#allocation2 + $0x1e]] }
  0x25   :  { %v100_v59 = vmul.f32 %v99_v52, %v98_v55  ;;  %v117_v61 = vmul.f32 %v116_v58, %v211_v0  ;;  %v118_v62 = vstv %s168_s10 }
  0x26   :  { %v109_v63 = vmax.f32 %v108_v57, 0.0  ;;  %v121_v5 = vstv %s236_s11 }
  0x27   :  { %v101_v1 = vadd.f32 %v100_v59, %v90_v56  ;;  %v119_v2 = vadd.f32 %v118_v62, %v117_v61  ;;  %v127_v3 = vstv %s170_s12 }
  0x28   :  { %v111_v4 = vmul.f32 %v110_v60, %v109_v63  ;;  %v128_v6 = vmul.f32 %v127_v3, %v211_v0  ;;  %v129_v7 = vstv %s171_s13 }
  0x29   :  { %v120_v8 = vmax.f32 %v119_v2, 0.0  ;;  %v132_v12 = vstv %s172_s14 }
  0x2a   :  { %v112_v9 = vadd.f32 %v111_v4, %v101_v1  ;;  %v130_v10 = vadd.f32 %v129_v7, %v128_v6  ;;  %v136_v16 = vstv %s173_s15 }
  0x2b   :  { %v122_v11 = vmul.f32 %v121_v5, %v120_v8 }
  0x2c   :  { %v131_v13 = vmax.f32 %v130_v10, 0.0 }
  0x2d   :  { %v123_v14 = vadd.f32 %v122_v11, %v112_v9 }
  0x2e   :  { %v133_v15 = vmul.f32 %v132_v12, %v131_v13 }
  0x30   :  { %v134_v17 = vadd.f32 %v133_v15, %v123_v14 }
  0x32   :  { %v137_v18 = vadd.f32 %v136_v16, %v134_v17 }
  0x34   :  { %138 = vst [vmem:[%s249_s2] sm:$0x1] %v137_v18 }
  0x35   :  { %143 = vsyncpa [#allocation3], 1 }

</bundles_post_ra>
